<compile_context>
chip_gen: v7x
topology: tpu7x:2x2x1
jax: 0.10.0
libtpu: 0.0.40
codegen_flags: <defaults>
</compile_context>

<pallas_src>
import jax
import jax.numpy as jnp
from jax import lax
from jax.experimental import pallas as pl
from jax.experimental.pallas import tpu as pltpu

EPS = 1e-5  # nn.InstanceNorm2d default

_MIN_GRID_STEPS = 8          # >= 4 steps per TensorCore on v7x megacore
_MIN_BLOCK_BYTES = 1 << 20   # keep each input block >= ~1 MiB of native data


def _round_up(a: int, b: int) -> int:
    return (a + b - 1) // b * b


def _sublane(itemsize: int) -> int:
    if itemsize >= 4:
        return 8
    if itemsize == 2:
        return 16
    return 32


def _vmem_budget_and_cap():
    """Generation-aware (data budget, vmem_limit cap) in bytes."""
    try:
        phys = pltpu.get_tpu_info().vmem_capacity_bytes
    except Exception:
        phys = 64 << 20                      # assume tightest part (v7x)
    if phys >= (96 << 20):                   # v5e / v6e: 128 MiB physical VMEM
        return 64 << 20, 96 << 20
    return 24 << 20, 40 << 20                # v7x: 64 MiB physical VMEM


# ----------------------------------------------------------------------------
# Whole-row path (one block spans the full H*W of each row).
# ----------------------------------------------------------------------------

def _instance_norm_kernel(x_ref, o_ref):
    # x_ref: (row_tile, H*W) -- one row per (n, c) instance.
    # Two-pass (centered) variance: second pass is over the VMEM-resident
    # tile and is essentially free in this mem-bound kernel, but avoids the
    # sum/sumsq cancellation when |mean| >> std.
    x = x_ref[...].astype(jnp.float32)
    inv_hw = 1.0 / x.shape[-1]
    mean = jnp.sum(x, axis=-1, keepdims=True) * inv_hw
    c = x - mean
    var = jnp.sum(c * c, axis=-1, keepdims=True) * inv_hw
    inv = lax.rsqrt(var + EPS)               # EUP rsqrt
    o_ref[...] = (c * inv).astype(o_ref.dtype)


def _choose_row_tile(rows: int, hw: int, itemsize: int, budget: int) -> int:
    sub = _sublane(itemsize)
    rows_ceil = _round_up(rows, sub)
    # Per-row VMEM cost: double-buffered in + out (native dtype) plus ~2
    # tile-sized f32 temporaries live in the two-pass kernel body.
    bytes_per_row = hw * (4 * itemsize + 2 * 4)
    tile = max(sub, (budget // max(bytes_per_row, 1)) // sub * sub)
    tile = min(tile, rows_ceil)
    # Keep >= _MIN_GRID_STEPS grid steps so the BlockSpec pipeline
    # double-buffers within each core and read/write DMAs overlap, as long
    # as each block keeps >= ~1 MiB of native input.
    if rows >= _MIN_GRID_STEPS * sub:
        stepped = _round_up(pl.cdiv(rows, _MIN_GRID_STEPS), sub)
        min_rows_blk = _round_up(pl.cdiv(_MIN_BLOCK_BYTES, max(hw * itemsize, 1)), sub)
        tile = min(tile, max(stepped, min_rows_blk))
    if tile >= rows:
        tile = rows   # single full-extent block: any row count is legal
    return tile


def _whole_row_instance_norm(x2d, rows, hw, itemsize, budget, cap, row_tile=None):
    if row_tile is None:
        row_tile = _choose_row_tile(rows, hw, itemsize, budget)
    else:
        row_tile = min(int(row_tile), rows)

    grid = (pl.cdiv(rows, row_tile),)

    vmem_need = 4 * row_tile * hw * itemsize + 2 * row_tile * hw * 4 + (2 << 20)
    vmem_limit = int(min(max(vmem_need, 16 << 20), cap))

    cost = pl.CostEstimate(flops=7 * rows * hw,
                           transcendentals=rows,
                           bytes_accessed=2 * rows * hw * itemsize)

    return pl.pallas_call(
        _instance_norm_kernel,
        out_shape=jax.ShapeDtypeStruct((rows, hw), x2d.dtype),
        grid_spec=pltpu.PrefetchScalarGridSpec(
            num_scalar_prefetch=0,
            grid=grid,
            in_specs=[pl.BlockSpec((row_tile, hw), lambda i: (i, 0))],
            out_specs=pl.BlockSpec((row_tile, hw), lambda i: (i, 0)),
        ),
        compiler_params=pltpu.CompilerParams(
            dimension_semantics=("parallel",),
            vmem_limit_bytes=vmem_limit,
        ),
        cost_estimate=cost,
    )(x2d)


# ----------------------------------------------------------------------------
# Chunked fallback for very large H*W (bounds VMEM; 2-read + 1-write floor).
# ----------------------------------------------------------------------------

def _make_stats_kernel(hw_total: int, hw_chunk: int, n_chunks: int):
    inv_hw = 1.0 / hw_total
    needs_mask = (hw_total % hw_chunk) != 0

    def kernel(x_ref, mean_ref, inv_ref):
        k = pl.program_id(1)

        @pl.when(k == 0)
        def _():
            mean_ref[...] = jnp.zeros_like(mean_ref)
            inv_ref[...] = jnp.zeros_like(inv_ref)

        x = x_ref[...].astype(jnp.float32)
        if needs_mask:
            lane = lax.broadcasted_iota(jnp.int32, x.shape, x.ndim - 1)
            valid = (k * hw_chunk + lane) < hw_total
            x = jnp.where(valid, x, 0.0)

        # Accumulate sum / sumsq directly into the (resident) output blocks.
        mean_ref[...] += jnp.sum(x, axis=-1, keepdims=True)
        inv_ref[...] += jnp.sum(x * x, axis=-1, keepdims=True)

        @pl.when(k == n_chunks - 1)
        def _():
            s = mean_ref[...]
            ss = inv_ref[...]
            m = s * inv_hw
            v = jnp.maximum(ss * inv_hw - m * m, 0.0)
            mean_ref[...] = m
            inv_ref[...] = lax.rsqrt(v + EPS)

    return kernel


def _normalize_kernel(x_ref, mean_ref, inv_ref, o_ref):
    x = x_ref[...].astype(jnp.float32)
    o_ref[...] = ((x - mean_ref[...]) * inv_ref[...]).astype(o_ref.dtype)


def _chunked_instance_norm(x2d, rows, hw, itemsize, budget, cap, hw_chunk=None):
    sub = _sublane(itemsize)
    rows_ceil = _round_up(rows, sub)
    row_tile = min(rows_ceil, 8 * sub)

    per_elem = 4 * itemsize + 2 * 4
    if hw_chunk is None:
        hw_chunk = max(512, (budget // max(row_tile * per_elem, 1)) // 128 * 128)
    hw_chunk = int(min(hw_chunk, _round_up(hw, 128)))
    hw_chunk = max(128, hw_chunk // 128 * 128)
    if hw <= hw_chunk:
        hw_chunk = hw                      # single full-extent lane block
    if row_tile >= rows:
        row_tile = rows

    n_row_blocks = pl.cdiv(rows, row_tile)
    n_chunks = pl.cdiv(hw, hw_chunk)

    vmem_need = row_tile * hw_chunk * (4 * itemsize + 2 * 4) + (2 << 20)
    vmem_limit = int(min(max(vmem_need, 16 << 20), cap))

    mean, inv = pl.pallas_call(
        _make_stats_kernel(hw, hw_chunk, n_chunks),
        out_shape=(jax.ShapeDtypeStruct((rows, 1), jnp.float32),
                   jax.ShapeDtypeStruct((rows, 1), jnp.float32)),
        grid_spec=pltpu.PrefetchScalarGridSpec(
            num_scalar_prefetch=0,
            grid=(n_row_blocks, n_chunks),
            in_specs=[pl.BlockSpec((row_tile, hw_chunk), lambda i, k: (i, k))],
            out_specs=(pl.BlockSpec((row_tile, 1), lambda i, k: (i, 0)),
                       pl.BlockSpec((row_tile, 1), lambda i, k: (i, 0))),
        ),
        compiler_params=pltpu.CompilerParams(
            dimension_semantics=("parallel", "arbitrary"),
            vmem_limit_bytes=vmem_limit,
        ),
        cost_estimate=pl.CostEstimate(flops=3 * rows * hw,
                                      transcendentals=rows,
                                      bytes_accessed=rows * hw * itemsize),
    )(x2d)

    out2d = pl.pallas_call(
        _normalize_kernel,
        out_shape=jax.ShapeDtypeStruct((rows, hw), x2d.dtype),
        grid_spec=pltpu.PrefetchScalarGridSpec(
            num_scalar_prefetch=0,
            grid=(n_row_blocks, n_chunks),
            in_specs=[pl.BlockSpec((row_tile, hw_chunk), lambda i, k: (i, k)),
                      pl.BlockSpec((row_tile, 1), lambda i, k: (i, 0)),
                      pl.BlockSpec((row_tile, 1), lambda i, k: (i, 0))],
            out_specs=pl.BlockSpec((row_tile, hw_chunk), lambda i, k: (i, k)),
        ),
        compiler_params=pltpu.CompilerParams(
            dimension_semantics=("parallel", "arbitrary"),
            vmem_limit_bytes=vmem_limit,
        ),
        cost_estimate=pl.CostEstimate(flops=2 * rows * hw,
                                      transcendentals=0,
                                      bytes_accessed=2 * rows * hw * itemsize),
    )(x2d, mean, inv)
    return out2d


# ----------------------------------------------------------------------------
# Public wrapper (matches conv_norm.forward with default norm='in').
# ----------------------------------------------------------------------------

def conv_norm_forward(x, *, force_chunked=False, hw_chunk=None, row_tile=None):
    """x: (N, C, H, W) -> instance-normalized (N, C, H, W); stats in f32."""
    N, C, H, W = x.shape
    rows = N * C
    hw = H * W
    itemsize = jnp.dtype(x.dtype).itemsize
    budget, cap = _vmem_budget_and_cap()
    sub = _sublane(itemsize)

    # Lane density note: rows sit on sublanes, H*W on lanes; when H*W is not
    # a multiple of 128 the stores are partially masked.  For small-H*W /
    # large-C shapes an alternate (N*H*W, C) layout (C on lanes) would give
    # lane-dense stores; typical feature maps have H*W >> C so the row layout
    # is kept here.
    x2d = x.reshape(rows, hw)

    # If even `sub` whole rows would blow the VMEM budget (very large H*W),
    # fall back to the chunked two-call path.
    whole_row_bytes = sub * hw * (4 * itemsize + 2 * 4)
    if force_chunked or whole_row_bytes > budget:
        out2d = _chunked_instance_norm(x2d, rows, hw, itemsize, budget, cap, hw_chunk)
    else:
        out2d = _whole_row_instance_norm(x2d, rows, hw, itemsize, budget, cap, row_tile)
    return out2d.reshape(N, C, H, W)


def _reference(x):
    # Pure-JAX reference matching nn.InstanceNorm2d(affine=False).
    xf = x.astype(jnp.float32)
    mean = jnp.mean(xf, axis=(2, 3), keepdims=True)
    var = jnp.mean((xf - mean) ** 2, axis=(2, 3), keepdims=True)
    return ((xf - mean) / jnp.sqrt(var + EPS)).astype(x.dtype)


if __name__ == "__main__":
    # Primary check: planes=4 channels, batch 2, 16x16 spatial (NCHW), f32.
    x = jax.random.normal(jax.random.PRNGKey(0), (2, 4, 16, 16), dtype=jnp.float32)
    out = jax.block_until_ready(conv_norm_forward(x))
    ref = _reference(x)
    assert out.shape == x.shape and out.dtype == x.dtype
    assert jnp.allclose(out, ref, atol=1e-5, rtol=1e-5), "f32 mismatch vs reference"

    # Odd channel count + bf16: ragged row count (full-extent row block) and
    # dtype-aware sublane tiling; HBM traffic stays bf16.
    xb = jax.random.normal(jax.random.PRNGKey(1), (1, 6, 20, 20), dtype=jnp.bfloat16)
    outb = jax.block_until_ready(conv_norm_forward(xb))
    refb = _reference(xb)
    assert outb.shape == xb.shape
    assert jnp.allclose(outb.astype(jnp.float32), refb.astype(jnp.float32),
                        atol=8e-2, rtol=8e-2), "bf16 mismatch vs reference"

    # Ragged rows with a forced small row tile: exercises the masked partial
    # last row block (no wrapper pad/slice).
    xr = jax.random.normal(jax.random.PRNGKey(3), (3, 5, 16, 16), dtype=jnp.float32)
    outr = jax.block_until_ready(conv_norm_forward(xr, row_tile=8))
    refr = _reference(xr)
    assert jnp.allclose(outr, refr, atol=1e-5, rtol=1e-5), "partial-block mismatch"

    # Force the large-H*W chunked (stats + normalize) path on a small shape:
    # hw=400 with 128-lane chunks -> 4 chunks including a masked partial one.
    xc = jax.random.normal(jax.random.PRNGKey(2), (1, 6, 20, 20), dtype=jnp.float32)
    outc = jax.block_until_ready(conv_norm_forward(xc, force_chunked=True, hw_chunk=128))
    refc = _reference(xc)
    assert jnp.allclose(outc, refc, atol=1e-4, rtol=1e-4), "chunked-path mismatch"

    print("KERNEL_OK")
</pallas_src>

<mosaic_0001>
module attributes {stable_mosaic.version = 11 : i64} {
  func.func @_instance_norm_kernel(%arg0: i32, %arg1: memref<8x256xf32, #tpu.memory_space<vmem>>, %arg2: memref<8x256xf32, #tpu.memory_space<vmem>>) attributes {dimension_semantics = [#tpu.dimension_semantics<parallel>], iteration_bounds = array<i64: 1>, scalar_prefetch = 0 : i64, scratch_operands = 0 : i64, tpu.core_type = #tpu.core_type<tc>, window_params = [{transform_indices = @transform_0, window_bounds = array<i64: 8, 256>}, {transform_indices = @transform_1, window_bounds = array<i64: 8, 256>}]} {
    %c0 = arith.constant 0 : index
    %c0_0 = arith.constant 0 : index
    %0 = vector.load %arg1[%c0, %c0_0] : memref<8x256xf32, #tpu.memory_space<vmem>>, vector<8x256xf32>
    %cst = arith.constant dense<0.000000e+00> : vector<8xf32>
    %1 = vector.multi_reduction <add>, %0, %cst [1] : vector<8x256xf32> to vector<8xf32>
    %2 = vector.shape_cast %1 : vector<8xf32> to vector<8x1xf32>
    %cst_1 = arith.constant 3.906250e-03 : f32
    %3 = vector.broadcast %cst_1 : f32 to vector<8x1xf32>
    %4 = arith.mulf %2, %3 : vector<8x1xf32>
    %5 = vector.broadcast %4 : vector<8x1xf32> to vector<8x256xf32>
    %6 = arith.subf %0, %5 : vector<8x256xf32>
    %7 = arith.mulf %6, %6 : vector<8x256xf32>
    %cst_2 = arith.constant dense<0.000000e+00> : vector<8xf32>
    %8 = vector.multi_reduction <add>, %7, %cst_2 [1] : vector<8x256xf32> to vector<8xf32>
    %9 = vector.shape_cast %8 : vector<8xf32> to vector<8x1xf32>
    %cst_3 = arith.constant 3.906250e-03 : f32
    %10 = vector.broadcast %cst_3 : f32 to vector<8x1xf32>
    %11 = arith.mulf %9, %10 : vector<8x1xf32>
    %cst_4 = arith.constant 9.99999974E-6 : f32
    %12 = vector.broadcast %cst_4 : f32 to vector<8x1xf32>
    %13 = arith.addf %11, %12 : vector<8x1xf32>
    %14 = math.rsqrt %13 : vector<8x1xf32>
    %15 = vector.broadcast %14 : vector<8x1xf32> to vector<8x256xf32>
    %16 = arith.mulf %6, %15 : vector<8x256xf32>
    %c0_5 = arith.constant 0 : index
    %c0_6 = arith.constant 0 : index
    %17 = vector.load %arg2[%c0_5, %c0_6] : memref<8x256xf32, #tpu.memory_space<vmem>>, vector<8x256xf32>
    tpu.vector_store %arg2[%c0_5, %c0_6], %16 {strides = array<i32>} : memref<8x256xf32, #tpu.memory_space<vmem>>, vector<8x256xf32>,
    return
  }
  func.func @transform_0(%arg0: i32) -> (i32, i32) {
    %c0_i32 = arith.constant 0 : i32
    %c0_i32_0 = arith.constant 0 : i32
    return %arg0, %c0_i32 : i32, i32
  }
  func.func @transform_1(%arg0: i32) -> (i32, i32) {
    %c0_i32 = arith.constant 0 : i32
    %c0_i32_0 = arith.constant 0 : i32
    return %arg0, %c0_i32 : i32, i32
  }
}

</mosaic_0001>

<bundles_post_ra>
// kernel: tpu_custom_call.1
= control target key start
LH: loop header
LB: loop body
LE: loop exit
PB: predicated region body
PF: predicated region fallthrough
CT: control target
= control target key end

     0   :  { %6 = vsyncpa [#allocation3], 0  ;;  %s144_s0 = inlined_call_operand.hbm [shape: f32[8,256], index: 0, kind: input, shape index: {}]   ;;  %s145_s1 = inlined_call_operand.hbm [shape: f32[8,256], index: 1, kind: output, shape index: {}]  }
   0x1   :  { %7 = vsyncpa [#allocation4], 0  ;;  %s108_s6 = smov [#allocation2]   ;;  %s60_s10 = scalar_lea.hbm %s144_s0, 256 }
   0x2   :  { %s14_s7 = sshll.u32 %s108_s6, 4  ;;  %p61_p0 = scmp.ne.s32.totalorder %s144_s0, %s60_s10  ;;  %s15_s7 = int_to_ptr.vmem [resolvable:$true] %s14_s7 }
   0x3   :  { %p64_p1 = scmp.lt.u32.totalorder %s60_s10, %s144_s0 }
   0x5   :  { %p66_p2 = pnand %p64_p1, %p61_p0 }
   0x7   :  { %69 = shalt.err (!%p66_p2)
}
   0x8   :  { %s70_s15 = scalar_lea.vmem %s15_s7, 256  ;;  %p75_p4 = scmp.lt.s32.totalorder %s15_s7, %s15_s7 }
   0x9   :  { %p71_p3 = scmp.ne.s32.totalorder %s15_s7, %s70_s15  ;;  %p76_p5 = scmp.lt.s32.totalorder %s70_s15, %s70_s15 }
   0xb   :  { %p77_p6 = por %p76_p5, %p75_p4 }
   0xd   :  { %p78_p7 = pnand %p77_p6, %p71_p3 }
   0xf   :  { %81 = shalt.err (!%p78_p7)
}
  0x10   :  { %17 = dma.hbm_to_vmem [thread:$0]  %s144_s0, 256, %s15_s7, [#allocation3]  }
  0x11   :  { %104 = dma.done.wait [#allocation3], 256  }
  0x12   :  { %105 = vsyncadd [#allocation3], 4294967040  ;;  %v21_v0 = vld [vmem:[#allocation2] sm:$0xff]  ;;  %v22_v1 = vld [vmem:[#allocation2 + $0x8] sm:$0xff]  ;;  %s109_s18 = smov [#allocation5]  }
  0x13   :  { %v23_v2 = vadd.f32 %v22_v1, %v21_v0  ;;  %s47_s0 = sshll.u32 %s109_s18, 4  ;;  %s48_s0 = int_to_ptr.vmem [resolvable:$true] %s47_s0 }
  0x14   :  { %s82_s19 = scalar_lea.vmem %s48_s0, 256  ;;  %p87_p9 = scmp.lt.s32.totalorder %s48_s0, %s48_s0 }
  0x15   :  { %24 = vadd.xlane.f32.xlu0 %v23_v2  ;;  %p83_p8 = scmp.ne.s32.totalorder %s48_s0, %s82_s19  ;;  %p88_p10 = scmp.lt.s32.totalorder %s82_s19, %s82_s19 }
  0x17   :  { %p89_p11 = por %p88_p10, %p87_p9 }
  0x19   :  { %p90_p12 = pnand %p89_p11, %p83_p8 }
  0xa2   :  { %v25_v3 = vpop.xlane.xlu0 %24 }
  0xa3   :  { %v26_v4 = vmul.f32 0.00390625, %v25_v3 }
  0xa5   :  { %v27_v5 = vsub.f32 %v21_v0, %v26_v4  ;;  %v28_v6 = vsub.f32 %v22_v1, %v26_v4 }
  0xa7   :  { %v29_v7 = vmul.f32 %v27_v5, %v27_v5  ;;  %v30_v8 = vmul.f32 %v28_v6, %v28_v6 }
  0xa9   :  { %v31_v9 = vadd.f32 %v30_v8, %v29_v7 }
  0xab   :  { %32 = vadd.xlane.f32.xlu0 %v31_v9 }
 0x138   :  { %v33_v10 = vpop.xlane.xlu0 %32 }
 0x139   :  { %v34_v11 = vmul.f32 0.00390625, %v33_v10 }
 0x13b   :  { %v35_v12 = vadd.f32 1e-05, %v34_v11 }
 0x13d   :  { %58 = vrsqrt.f32 %v35_v12 }
 0x147   :  { %v59_v13 = vpop.eup %58 }
 0x148   :  { %v37_v14 = vmul.f32 %v59_v13, %v27_v5  ;;  %v38_v15 = vmul.f32 %v59_v13, %v28_v6 }
 0x14a   :  { %39 = vst [vmem:[#allocation5] sm:$0xff] %v37_v14  ;;  %40 = vst [vmem:[#allocation5 + $0x8] sm:$0xff] %v38_v15 }
 0x14b   :  { %93 = shalt.err (!%p90_p12)
}
 0x14c   :  { %s94_s22 = scalar_lea.hbm %s145_s1, 256 }
 0x14d   :  { %p95_p13 = scmp.ne.s32.totalorder %s145_s1, %s94_s22  ;;  %p98_p0 = scmp.lt.u32.totalorder %s94_s22, %s145_s1 }
 0x14f   :  { %p100_p1 = pnand %p98_p0, %p95_p13 }
 0x151   :  { %103 = shalt.err (!%p100_p1)
}
 0x152   :  { %50 = dma.vmem_to_hbm [thread:$0]  %s48_s0, 256, %s145_s1, [#allocation4]  }
 0x153   :  { %106 = dma.done.wait [#allocation4], 256  }
 0x154   :  { %107 = vsyncadd [#allocation4], 4294967040 }
 0x155   :  { %54 = vsyncpa [#allocation3], 1 }
 0x156   :  { %55 = vsyncpa [#allocation4], 1 }

</bundles_post_ra>
